<compile_context>
chip_gen: v7x
topology: tpu7x:2x2x1
jax: 0.10.0
libtpu: 0.0.40
codegen_flags: <defaults>
</compile_context>

<pallas_src>
import functools

import jax
import jax.numpy as jnp
from jax import lax
from jax.experimental import pallas as pl
from jax.experimental.pallas import tpu as pltpu


LANE = 128


# ------------------------------ Pallas kernel ------------------------------- #

def fused_graphsage_kernel(x_ref, a_ref, w_ref, b_ref, g_ref, beta_ref,
                           emb_ref, out_ref, *, num_layers, cp, out_dim):
    """All SAGEConv layers + BatchNorm1d + log_softmax in one kernel.

    x_ref   : (N, Cp)        f32   node features, channel-padded
    a_ref   : (N, N)         bf16  row-normalized adjacency (rows sum to 1)
    w_ref   : (L, 2*Cp, Cp)  bf16  stacked [[W_l],[W_r]] per layer (in, out)
    b_ref   : (L, 1, Cp)     f32   folded bias b_l + b_r per layer
    g_ref   : (L-1, 1, Cp)   f32   BN gamma
    beta_ref: (L-1, 1, Cp)   f32   BN beta
    emb_ref : (N, Cp)        f32   raw last-layer output (padded)
    out_ref : (N, Cp)        f32   log_softmax over the first out_dim columns
    """
    a = a_ref[...]                                   # resident for all layers
    h = x_ref[...]
    for l in range(num_layers):
        hb = h.astype(jnp.bfloat16)                  # cast once, reused twice
        # Mean aggregation over neighbors (+ self-loop) as an MXU matmul.
        ah = jnp.dot(a, hb, preferred_element_type=jnp.float32)  # (N, Cp)
        # Single fused projection with K = 2*Cp:
        #   y = ah @ W_l + h @ W_r + (b_l + b_r)
        hcat = jnp.concatenate([ah.astype(jnp.bfloat16), hb], axis=1)  # (N, 2Cp)
        y = jnp.dot(hcat, w_ref[l], preferred_element_type=jnp.float32) + b_ref[l]
        if l < num_layers - 1:
            # BatchNorm1d, training-mode batch statistics (biased variance).
            mean = jnp.mean(y, axis=0, keepdims=True)
            var = jnp.mean((y - mean) ** 2, axis=0, keepdims=True)
            h = (y - mean) * lax.rsqrt(var + 1e-5) * g_ref[l] + beta_ref[l]
        else:
            emb_ref[...] = y
            # Mask channel padding so it cannot contribute to the softmax.
            col = lax.broadcasted_iota(jnp.int32, y.shape, 1)
            ym = jnp.where(col < out_dim, y, jnp.float32(-1e30))
            m = jnp.max(ym, axis=1, keepdims=True)
            z = ym - m
            lse = jnp.log(jnp.sum(jnp.exp(z), axis=1, keepdims=True))
            out_ref[...] = z - lse


def _full_spec(shape):
    # Whole-array block (allowed even when not (8,128)-divisible), 1 grid step.
    return pl.BlockSpec(shape, lambda i: tuple(0 for _ in shape))


# ------------------------- graph / parameter setup -------------------------- #

def build_norm_adj(edge_index, num_nodes):
    """Dense row-normalized adjacency matching remove_self_loops +
    add_self_loops + scatter-mean aggregation (target <- source).

    Per-graph preprocessing: call ONCE per graph and pass the result to
    graphsage_forward (hoisted off the per-call critical path)."""
    src, dst = edge_index[0], edge_index[1]
    keep = (src != dst).astype(jnp.float32)                      # remove_self_loops
    counts = jnp.zeros((num_nodes, num_nodes), jnp.float32).at[dst, src].add(keep)
    counts = counts + jnp.eye(num_nodes, dtype=jnp.float32)      # add_self_loops
    deg = jnp.sum(counts, axis=1, keepdims=True)
    return counts / deg


def init_linear(key, c_in, c_out):
    """PyTorch nn.Linear default init (uniform +-1/sqrt(c_in)); W stored (c_in, c_out)."""
    kw, kb = jax.random.split(key)
    bound = 1.0 / jnp.sqrt(jnp.float32(c_in))
    w = jax.random.uniform(kw, (c_in, c_out), jnp.float32, -bound, bound)
    b = jax.random.uniform(kb, (1, c_out), jnp.float32, -bound, bound)
    return w, b


def init_graphsage_params(key, num_layers, input_dim, hidden_unit, output_dim):
    dims = [input_dim] + [hidden_unit] * (num_layers - 1) + [output_dim]
    params = []
    for i in range(num_layers):
        key, kl, kr = jax.random.split(key, 3)
        wl, bl = init_linear(kl, dims[i], dims[i + 1])
        wr, br = init_linear(kr, dims[i], dims[i + 1])
        layer = {"wl": wl, "bl": bl, "wr": wr, "br": br}
        if i < num_layers - 1:  # BN after all but the last conv
            layer["gamma"] = jnp.ones((1, dims[i + 1]), jnp.float32)
            layer["beta"] = jnp.zeros((1, dims[i + 1]), jnp.float32)
        params.append(layer)
    return params


def pack_params(params):
    """Pad channels to a multiple of 128, stack [[W_l],[W_r]] along the
    contraction axis (K = 2*Cp), fold biases, stack across layers."""
    max_dim = max(max(layer["wl"].shape) for layer in params)
    cp = LANE * ((max_dim + LANE - 1) // LANE)
    ws, bs, gs, betas = [], [], [], []
    for layer in params:
        c_in, c_out = layer["wl"].shape
        w = jnp.zeros((2 * cp, cp), jnp.float32)
        w = w.at[:c_in, :c_out].set(layer["wl"])            # rows [0,Cp):  W_l
        w = w.at[cp:cp + c_in, :c_out].set(layer["wr"])     # rows [Cp,2Cp): W_r
        ws.append(w.astype(jnp.bfloat16))
        bs.append(jnp.zeros((1, cp), jnp.float32)
                  .at[:, :c_out].set(layer["bl"] + layer["br"]))
        if "gamma" in layer:
            gs.append(jnp.zeros((1, cp), jnp.float32)
                      .at[:, :c_out].set(layer["gamma"]))
            betas.append(jnp.zeros((1, cp), jnp.float32)
                         .at[:, :c_out].set(layer["beta"]))
    return {"w": jnp.stack(ws), "b": jnp.stack(bs),
            "gamma": jnp.stack(gs), "beta": jnp.stack(betas)}


# --------------------------------- forward ---------------------------------- #

@functools.partial(jax.jit, static_argnames=("output_dim",))
def graphsage_forward(packed, x, adj, output_dim):
    """adj: precomputed row-normalized adjacency (bf16), built once per graph."""
    num_nodes, input_dim = x.shape
    assert num_nodes % 8 == 0, "node count must be a multiple of 8 (sublanes)"
    w_all, b_all = packed["w"], packed["b"]
    g_all, beta_all = packed["gamma"], packed["beta"]
    num_layers, cp = w_all.shape[0], w_all.shape[2]

    x_pad = jnp.pad(x, ((0, 0), (0, cp - input_dim)))

    kernel = functools.partial(fused_graphsage_kernel,
                               num_layers=num_layers, cp=cp, out_dim=output_dim)
    emb_pad, out_pad = pl.pallas_call(
        kernel,
        out_shape=(jax.ShapeDtypeStruct((num_nodes, cp), jnp.float32),
                   jax.ShapeDtypeStruct((num_nodes, cp), jnp.float32)),
        grid=(1,),
        in_specs=[_full_spec(x_pad.shape), _full_spec(adj.shape),
                  _full_spec(w_all.shape), _full_spec(b_all.shape),
                  _full_spec(g_all.shape), _full_spec(beta_all.shape)],
        out_specs=(_full_spec((num_nodes, cp)), _full_spec((num_nodes, cp))),
        compiler_params=pltpu.CompilerParams(
            dimension_semantics=("arbitrary",)),
    )(x_pad, adj, w_all, b_all, g_all, beta_all)

    # TODO(synk): dropout_rate is declared in the PyTorch __init__ but never
    # used in forward; omitted here as well.
    return {"out": out_pad[:, :output_dim], "emb": emb_pad[:, :output_dim]}


# ----------------------------------- main ----------------------------------- #

if __name__ == "__main__":
    num_layers = 3
    input_dim = 16
    hidden_unit = 32
    output_dim = 8
    num_nodes = 64
    num_edges = 256

    key = jax.random.PRNGKey(0)
    k_x, k_e, k_p = jax.random.split(key, 3)

    x = jax.random.normal(k_x, (num_nodes, input_dim), jnp.float32)
    edge_index = jax.random.randint(k_e, (2, num_edges), 0, num_nodes, jnp.int32)

    params = init_graphsage_params(k_p, num_layers, input_dim, hidden_unit, output_dim)
    packed = pack_params(params)

    # Graph preprocessing done once, off the per-call critical path.
    adj = build_norm_adj(edge_index, num_nodes).astype(jnp.bfloat16)
    adj = jax.block_until_ready(adj)

    result = graphsage_forward(packed, x, adj, output_dim)
    jax.block_until_ready(result)

    assert result["out"].shape == (num_nodes, output_dim)
    assert result["emb"].shape == (num_nodes, output_dim)
    print("KERNEL_OK")
</pallas_src>

<mosaic_0001>
module attributes {stable_mosaic.version = 11 : i64} {
  func.func @fused_graphsage_kernel(%arg0: i32, %arg1: memref<64x128xf32, #tpu.memory_space<vmem>>, %arg2: memref<64x64xbf16, #tpu.memory_space<vmem>>, %arg3: memref<3x256x128xbf16, #tpu.memory_space<vmem>>, %arg4: memref<3x1x128xf32, #tpu.memory_space<vmem>>, %arg5: memref<2x1x128xf32, #tpu.memory_space<vmem>>, %arg6: memref<2x1x128xf32, #tpu.memory_space<vmem>>, %arg7: memref<64x128xf32, #tpu.memory_space<vmem>>, %arg8: memref<64x128xf32, #tpu.memory_space<vmem>>) attributes {dimension_semantics = [#tpu.dimension_semantics<arbitrary>], iteration_bounds = array<i64: 1>, scalar_prefetch = 0 : i64, scratch_operands = 0 : i64, tpu.core_type = #tpu.core_type<tc>, window_params = [{pipeline_mode = #tpu.pipeline_mode<synchronous>, transform_indices = @transform_0, window_bounds = array<i64: 64, 128>}, {pipeline_mode = #tpu.pipeline_mode<synchronous>, transform_indices = @transform_1, window_bounds = array<i64: 64, 64>}, {pipeline_mode = #tpu.pipeline_mode<synchronous>, transform_indices = @transform_2, window_bounds = array<i64: 3, 256, 128>}, {pipeline_mode = #tpu.pipeline_mode<synchronous>, transform_indices = @transform_3, window_bounds = array<i64: 3, 1, 128>}, {pipeline_mode = #tpu.pipeline_mode<synchronous>, transform_indices = @transform_4, window_bounds = array<i64: 2, 1, 128>}, {pipeline_mode = #tpu.pipeline_mode<synchronous>, transform_indices = @transform_5, window_bounds = array<i64: 2, 1, 128>}, {pipeline_mode = #tpu.pipeline_mode<synchronous>, transform_indices = @transform_6, window_bounds = array<i64: 64, 128>}, {pipeline_mode = #tpu.pipeline_mode<synchronous>, transform_indices = @transform_7, window_bounds = array<i64: 64, 128>}]} {
    %c0 = arith.constant 0 : index
    %c0_0 = arith.constant 0 : index
    %0 = vector.load %arg2[%c0, %c0_0] : memref<64x64xbf16, #tpu.memory_space<vmem>>, vector<64x64xbf16>
    %c0_1 = arith.constant 0 : index
    %c0_2 = arith.constant 0 : index
    %1 = vector.load %arg1[%c0_1, %c0_2] : memref<64x128xf32, #tpu.memory_space<vmem>>, vector<64x128xf32>
    %2 = arith.truncf %1 : vector<64x128xf32> to vector<64x128xbf16>
    %cst = arith.constant dense<0.000000e+00> : vector<64x128xf32>
    %3 = tpu.matmul %0, %2, %cst {dimension_numbers = #tpu.dot_dimension_numbers<[1], [0], [0], [1], [0, 0, 1, 1], [], []>} : vector<64x64xbf16>, vector<64x128xbf16>, vector<64x128xf32> -> vector<64x128xf32>
    %4 = arith.truncf %3 : vector<64x128xf32> to vector<64x128xbf16>
    %5 = tpu.concatenate %4, %2 in 1 : vector<64x128xbf16>, vector<64x128xbf16> -> vector<64x256xbf16>
    %c0_3 = arith.constant 0 : index
    %c0_4 = arith.constant 0 : index
    %c0_5 = arith.constant 0 : index
    %6 = vector.load %arg3[%c0_3, %c0_4, %c0_5] : memref<3x256x128xbf16, #tpu.memory_space<vmem>>, vector<1x256x128xbf16>
    %7 = vector.shape_cast %6 : vector<1x256x128xbf16> to vector<256x128xbf16>
    %cst_6 = arith.constant dense<0.000000e+00> : vector<64x128xf32>
    %8 = tpu.matmul %5, %7, %cst_6 {dimension_numbers = #tpu.dot_dimension_numbers<[1], [0], [0], [1], [0, 0, 1, 1], [], []>} : vector<64x256xbf16>, vector<256x128xbf16>, vector<64x128xf32> -> vector<64x128xf32>
    %c0_7 = arith.constant 0 : index
    %c0_8 = arith.constant 0 : index
    %c0_9 = arith.constant 0 : index
    %9 = vector.load %arg4[%c0_7, %c0_8, %c0_9] : memref<3x1x128xf32, #tpu.memory_space<vmem>>, vector<1x1x128xf32>
    %10 = vector.shape_cast %9 : vector<1x1x128xf32> to vector<1x128xf32>
    %11 = vector.broadcast %10 : vector<1x128xf32> to vector<64x128xf32>
    %12 = arith.addf %8, %11 : vector<64x128xf32>
    %cst_10 = arith.constant dense<0.000000e+00> : vector<128xf32>
    %13 = vector.multi_reduction <add>, %12, %cst_10 [0] : vector<64x128xf32> to vector<128xf32>
    %14 = vector.shape_cast %13 : vector<128xf32> to vector<1x128xf32>
    %cst_11 = arith.constant 6.400000e+01 : f32
    %15 = vector.broadcast %cst_11 : f32 to vector<1x128xf32>
    %16 = arith.divf %14, %15 : vector<1x128xf32>
    %17 = vector.broadcast %16 : vector<1x128xf32> to vector<64x128xf32>
    %18 = arith.subf %12, %17 : vector<64x128xf32>
    %19 = arith.mulf %18, %18 : vector<64x128xf32>
    %cst_12 = arith.constant dense<0.000000e+00> : vector<128xf32>
    %20 = vector.multi_reduction <add>, %19, %cst_12 [0] : vector<64x128xf32> to vector<128xf32>
    %21 = vector.shape_cast %20 : vector<128xf32> to vector<1x128xf32>
    %cst_13 = arith.constant 6.400000e+01 : f32
    %22 = vector.broadcast %cst_13 : f32 to vector<1x128xf32>
    %23 = arith.divf %21, %22 : vector<1x128xf32>
    %24 = vector.broadcast %16 : vector<1x128xf32> to vector<64x128xf32>
    %25 = arith.subf %12, %24 : vector<64x128xf32>
    %cst_14 = arith.constant 9.99999974E-6 : f32
    %26 = vector.broadcast %cst_14 : f32 to vector<1x128xf32>
    %27 = arith.addf %23, %26 : vector<1x128xf32>
    %28 = math.rsqrt %27 : vector<1x128xf32>
    %29 = vector.broadcast %28 : vector<1x128xf32> to vector<64x128xf32>
    %30 = arith.mulf %25, %29 : vector<64x128xf32>
    %c0_15 = arith.constant 0 : index
    %c0_16 = arith.constant 0 : index
    %c0_17 = arith.constant 0 : index
    %31 = vector.load %arg5[%c0_15, %c0_16, %c0_17] : memref<2x1x128xf32, #tpu.memory_space<vmem>>, vector<1x1x128xf32>
    %32 = vector.shape_cast %31 : vector<1x1x128xf32> to vector<1x128xf32>
    %33 = vector.broadcast %32 : vector<1x128xf32> to vector<64x128xf32>
    %34 = arith.mulf %30, %33 : vector<64x128xf32>
    %c0_18 = arith.constant 0 : index
    %c0_19 = arith.constant 0 : index
    %c0_20 = arith.constant 0 : index
    %35 = vector.load %arg6[%c0_18, %c0_19, %c0_20] : memref<2x1x128xf32, #tpu.memory_space<vmem>>, vector<1x1x128xf32>
    %36 = vector.shape_cast %35 : vector<1x1x128xf32> to vector<1x128xf32>
    %37 = vector.broadcast %36 : vector<1x128xf32> to vector<64x128xf32>
    %38 = arith.addf %34, %37 : vector<64x128xf32>
    %39 = arith.truncf %38 : vector<64x128xf32> to vector<64x128xbf16>
    %cst_21 = arith.constant dense<0.000000e+00> : vector<64x128xf32>
    %40 = tpu.matmul %0, %39, %cst_21 {dimension_numbers = #tpu.dot_dimension_numbers<[1], [0], [0], [1], [0, 0, 1, 1], [], []>} : vector<64x64xbf16>, vector<64x128xbf16>, vector<64x128xf32> -> vector<64x128xf32>
    %41 = arith.truncf %40 : vector<64x128xf32> to vector<64x128xbf16>
    %42 = tpu.concatenate %41, %39 in 1 : vector<64x128xbf16>, vector<64x128xbf16> -> vector<64x256xbf16>
    %c1 = arith.constant 1 : index
    %c0_22 = arith.constant 0 : index
    %c0_23 = arith.constant 0 : index
    %43 = vector.load %arg3[%c1, %c0_22, %c0_23] : memref<3x256x128xbf16, #tpu.memory_space<vmem>>, vector<1x256x128xbf16>
    %44 = vector.shape_cast %43 : vector<1x256x128xbf16> to vector<256x128xbf16>
    %cst_24 = arith.constant dense<0.000000e+00> : vector<64x128xf32>
    %45 = tpu.matmul %42, %44, %cst_24 {dimension_numbers = #tpu.dot_dimension_numbers<[1], [0], [0], [1], [0, 0, 1, 1], [], []>} : vector<64x256xbf16>, vector<256x128xbf16>, vector<64x128xf32> -> vector<64x128xf32>
    %c1_25 = arith.constant 1 : index
    %c0_26 = arith.constant 0 : index
    %c0_27 = arith.constant 0 : index
    %46 = vector.load %arg4[%c1_25, %c0_26, %c0_27] : memref<3x1x128xf32, #tpu.memory_space<vmem>>, vector<1x1x128xf32>
    %47 = vector.shape_cast %46 : vector<1x1x128xf32> to vector<1x128xf32>
    %48 = vector.broadcast %47 : vector<1x128xf32> to vector<64x128xf32>
    %49 = arith.addf %45, %48 : vector<64x128xf32>
    %cst_28 = arith.constant dense<0.000000e+00> : vector<128xf32>
    %50 = vector.multi_reduction <add>, %49, %cst_28 [0] : vector<64x128xf32> to vector<128xf32>
    %51 = vector.shape_cast %50 : vector<128xf32> to vector<1x128xf32>
    %cst_29 = arith.constant 6.400000e+01 : f32
    %52 = vector.broadcast %cst_29 : f32 to vector<1x128xf32>
    %53 = arith.divf %51, %52 : vector<1x128xf32>
    %54 = vector.broadcast %53 : vector<1x128xf32> to vector<64x128xf32>
    %55 = arith.subf %49, %54 : vector<64x128xf32>
    %56 = arith.mulf %55, %55 : vector<64x128xf32>
    %cst_30 = arith.constant dense<0.000000e+00> : vector<128xf32>
    %57 = vector.multi_reduction <add>, %56, %cst_30 [0] : vector<64x128xf32> to vector<128xf32>
    %58 = vector.shape_cast %57 : vector<128xf32> to vector<1x128xf32>
    %cst_31 = arith.constant 6.400000e+01 : f32
    %59 = vector.broadcast %cst_31 : f32 to vector<1x128xf32>
    %60 = arith.divf %58, %59 : vector<1x128xf32>
    %61 = vector.broadcast %53 : vector<1x128xf32> to vector<64x128xf32>
    %62 = arith.subf %49, %61 : vector<64x128xf32>
    %cst_32 = arith.constant 9.99999974E-6 : f32
    %63 = vector.broadcast %cst_32 : f32 to vector<1x128xf32>
    %64 = arith.addf %60, %63 : vector<1x128xf32>
    %65 = math.rsqrt %64 : vector<1x128xf32>
    %66 = vector.broadcast %65 : vector<1x128xf32> to vector<64x128xf32>
    %67 = arith.mulf %62, %66 : vector<64x128xf32>
    %c1_33 = arith.constant 1 : index
    %c0_34 = arith.constant 0 : index
    %c0_35 = arith.constant 0 : index
    %68 = vector.load %arg5[%c1_33, %c0_34, %c0_35] : memref<2x1x128xf32, #tpu.memory_space<vmem>>, vector<1x1x128xf32>
    %69 = vector.shape_cast %68 : vector<1x1x128xf32> to vector<1x128xf32>
    %70 = vector.broadcast %69 : vector<1x128xf32> to vector<64x128xf32>
    %71 = arith.mulf %67, %70 : vector<64x128xf32>
    %c1_36 = arith.constant 1 : index
    %c0_37 = arith.constant 0 : index
    %c0_38 = arith.constant 0 : index
    %72 = vector.load %arg6[%c1_36, %c0_37, %c0_38] : memref<2x1x128xf32, #tpu.memory_space<vmem>>, vector<1x1x128xf32>
    %73 = vector.shape_cast %72 : vector<1x1x128xf32> to vector<1x128xf32>
    %74 = vector.broadcast %73 : vector<1x128xf32> to vector<64x128xf32>
    %75 = arith.addf %71, %74 : vector<64x128xf32>
    %76 = arith.truncf %75 : vector<64x128xf32> to vector<64x128xbf16>
    %cst_39 = arith.constant dense<0.000000e+00> : vector<64x128xf32>
    %77 = tpu.matmul %0, %76, %cst_39 {dimension_numbers = #tpu.dot_dimension_numbers<[1], [0], [0], [1], [0, 0, 1, 1], [], []>} : vector<64x64xbf16>, vector<64x128xbf16>, vector<64x128xf32> -> vector<64x128xf32>
    %78 = arith.truncf %77 : vector<64x128xf32> to vector<64x128xbf16>
    %79 = tpu.concatenate %78, %76 in 1 : vector<64x128xbf16>, vector<64x128xbf16> -> vector<64x256xbf16>
    %c2 = arith.constant 2 : index
    %c0_40 = arith.constant 0 : index
    %c0_41 = arith.constant 0 : index
    %80 = vector.load %arg3[%c2, %c0_40, %c0_41] : memref<3x256x128xbf16, #tpu.memory_space<vmem>>, vector<1x256x128xbf16>
    %81 = vector.shape_cast %80 : vector<1x256x128xbf16> to vector<256x128xbf16>
    %cst_42 = arith.constant dense<0.000000e+00> : vector<64x128xf32>
    %82 = tpu.matmul %79, %81, %cst_42 {dimension_numbers = #tpu.dot_dimension_numbers<[1], [0], [0], [1], [0, 0, 1, 1], [], []>} : vector<64x256xbf16>, vector<256x128xbf16>, vector<64x128xf32> -> vector<64x128xf32>
    %c2_43 = arith.constant 2 : index
    %c0_44 = arith.constant 0 : index
    %c0_45 = arith.constant 0 : index
    %83 = vector.load %arg4[%c2_43, %c0_44, %c0_45] : memref<3x1x128xf32, #tpu.memory_space<vmem>>, vector<1x1x128xf32>
    %84 = vector.shape_cast %83 : vector<1x1x128xf32> to vector<1x128xf32>
    %85 = vector.broadcast %84 : vector<1x128xf32> to vector<64x128xf32>
    %86 = arith.addf %82, %85 : vector<64x128xf32>
    %c0_46 = arith.constant 0 : index
    %c0_47 = arith.constant 0 : index
    %87 = vector.load %arg7[%c0_46, %c0_47] : memref<64x128xf32, #tpu.memory_space<vmem>>, vector<64x128xf32>
    tpu.vector_store %arg7[%c0_46, %c0_47], %86 {strides = array<i32>} : memref<64x128xf32, #tpu.memory_space<vmem>>, vector<64x128xf32>,
    %88 = tpu.iota {dimensions = array<i32: 1>} : vector<64x128xi32>
    %c8_i32 = arith.constant 8 : i32
    %89 = vector.broadcast %c8_i32 : i32 to vector<64x128xi32>
    %90 = arith.cmpi slt, %88, %89 : vector<64x128xi32>
    %cst_48 = arith.constant -1.000000e+30 : f32
    %91 = vector.broadcast %cst_48 : f32 to vector<64x128xf32>
    %92 = arith.select %90, %86, %91 : vector<64x128xi1>, vector<64x128xf32>
    %cst_49 = arith.constant dense<0xFF800000> : vector<64xf32>
    %93 = vector.multi_reduction <maximumf>, %92, %cst_49 [1] : vector<64x128xf32> to vector<64xf32>
    %94 = vector.shape_cast %93 : vector<64xf32> to vector<64x1xf32>
    %95 = vector.broadcast %94 : vector<64x1xf32> to vector<64x128xf32>
    %96 = arith.subf %92, %95 : vector<64x128xf32>
    %97 = math.exp %96 : vector<64x128xf32>
    %cst_50 = arith.constant dense<0.000000e+00> : vector<64xf32>
    %98 = vector.multi_reduction <add>, %97, %cst_50 [1] : vector<64x128xf32> to vector<64xf32>
    %99 = vector.shape_cast %98 : vector<64xf32> to vector<64x1xf32>
    %100 = math.log %99 : vector<64x1xf32>
    %101 = vector.broadcast %100 : vector<64x1xf32> to vector<64x128xf32>
    %102 = arith.subf %96, %101 : vector<64x128xf32>
    %c0_51 = arith.constant 0 : index
    %c0_52 = arith.constant 0 : index
    %103 = vector.load %arg8[%c0_51, %c0_52] : memref<64x128xf32, #tpu.memory_space<vmem>>, vector<64x128xf32>
    tpu.vector_store %arg8[%c0_51, %c0_52], %102 {strides = array<i32>} : memref<64x128xf32, #tpu.memory_space<vmem>>, vector<64x128xf32>,
    return
  }
  func.func @transform_0(%arg0: i32) -> (i32, i32) {
    %c0_i32 = arith.constant 0 : i32
    %c0_i32_0 = arith.constant 0 : i32
    %c0_i32_1 = arith.constant 0 : i32
    return %c0_i32, %c0_i32_0 : i32, i32
  }
  func.func @transform_1(%arg0: i32) -> (i32, i32) {
    %c0_i32 = arith.constant 0 : i32
    %c0_i32_0 = arith.constant 0 : i32
    %c0_i32_1 = arith.constant 0 : i32
    return %c0_i32, %c0_i32_0 : i32, i32
  }
  func.func @transform_2(%arg0: i32) -> (i32, i32, i32) {
    %c0_i32 = arith.constant 0 : i32
    %c0_i32_0 = arith.constant 0 : i32
    %c0_i32_1 = arith.constant 0 : i32
    %c0_i32_2 = arith.constant 0 : i32
    return %c0_i32, %c0_i32_0, %c0_i32_1 : i32, i32, i32
  }
  func.func @transform_3(%arg0: i32) -> (i32, i32, i32) {
    %c0_i32 = arith.constant 0 : i32
    %c0_i32_0 = arith.constant 0 : i32
    %c0_i32_1 = arith.constant 0 : i32
    %c0_i32_2 = arith.constant 0 : i32
    return %c0_i32, %c0_i32_0, %c0_i32_1 : i32, i32, i32
  }
  func.func @transform_4(%arg0: i32) -> (i32, i32, i32) {
    %c0_i32 = arith.constant 0 : i32
    %c0_i32_0 = arith.constant 0 : i32
    %c0_i32_1 = arith.constant 0 : i32
    %c0_i32_2 = arith.constant 0 : i32
    return %c0_i32, %c0_i32_0, %c0_i32_1 : i32, i32, i32
  }
  func.func @transform_5(%arg0: i32) -> (i32, i32, i32) {
    %c0_i32 = arith.constant 0 : i32
    %c0_i32_0 = arith.constant 0 : i32
    %c0_i32_1 = arith.constant 0 : i32
    %c0_i32_2 = arith.constant 0 : i32
    return %c0_i32, %c0_i32_0, %c0_i32_1 : i32, i32, i32
  }
  func.func @transform_6(%arg0: i32) -> (i32, i32) {
    %c0_i32 = arith.constant 0 : i32
    %c0_i32_0 = arith.constant 0 : i32
    %c0_i32_1 = arith.constant 0 : i32
    return %c0_i32, %c0_i32_0 : i32, i32
  }
  func.func @transform_7(%arg0: i32) -> (i32, i32) {
    %c0_i32 = arith.constant 0 : i32
    %c0_i32_0 = arith.constant 0 : i32
    %c0_i32_1 = arith.constant 0 : i32
    return %c0_i32, %c0_i32_0 : i32, i32
  }
}

</mosaic_0001>

<bundles_post_ra>
// kernel: graphsage_forward.1
= control target key start
LH: loop header
LB: loop body
LE: loop exit
PB: predicated region body
PF: predicated region fallthrough
CT: control target
= control target key end

     0   :  { %13 = vsyncpa [#allocation3], 0  ;;  %s1581_s24 = smov [#allocation2]   ;;  %s1811_s0 = inlined_call_operand.vmem [shape: f32[64,128], index: 0, kind: input, shape index: {}]   ;;  %s1812_s1 = inlined_call_operand.vmem [shape: bf16[64,64], index: 1, kind: input, shape index: {}]   ;;  %s1813_s2 = inlined_call_operand.hbm [shape: bf16[3,256,128], index: 2, kind: input, shape index: {}]   ;;  %s1814_s3 = inlined_call_operand.vmem [shape: f32[3,1,128], index: 3, kind: input, shape index: {}]   ;;  %s1815_s4 = inlined_call_operand.vmem [shape: f32[2,1,128], index: 4, kind: input, shape index: {}]   ;;  %s1816_s5 = inlined_call_operand.vmem [shape: f32[2,1,128], index: 5, kind: input, shape index: {}]   ;;  %s1817_s6 = inlined_call_operand.vmem [shape: f32[64,128], index: 6, kind: output, shape index: {0}]   ;;  %s1818_s7 = inlined_call_operand.vmem [shape: f32[64,128], index: 7, kind: output, shape index: {1}]  }
   0x1   :  { %s23_s25 = sshll.u32 %s1581_s24, 4  ;;  %s1557_s28 = scalar_lea.hbm %s1813_s2, 6144  ;;  %s24_s25 = int_to_ptr.vmem [resolvable:$true] %s23_s25 }
   0x2   :  { %p1558_p0 = scmp.ne.s32.totalorder %s1813_s2, %s1557_s28  ;;  %p1561_p1 = scmp.lt.u32.totalorder %s1557_s28, %s1813_s2 }
   0x4   :  { %p1563_p2 = pnand %p1561_p1, %p1558_p0 }
   0x6   :  { %1566 = shalt.err (!%p1563_p2)
}
   0x7   :  { %s1567_s10 = scalar_lea.vmem %s24_s25, 6144  ;;  %p1572_p4 = scmp.lt.s32.totalorder %s24_s25, %s24_s25 }
   0x8   :  { %p1568_p3 = scmp.ne.s32.totalorder %s24_s25, %s1567_s10  ;;  %p1573_p5 = scmp.lt.s32.totalorder %s1567_s10, %s1567_s10 }
   0xa   :  { %p1574_p6 = por %p1573_p5, %p1572_p4 }
   0xc   :  { %p1575_p7 = pnand %p1574_p6, %p1568_p3 }
   0xe   :  { %1578 = shalt.err (!%p1575_p7)
}
   0xf   :  { %s1582_s11 = smov 64   ;;  %s1583_s12 = smov 4  }
  0x10   :  { %29 = dma.hbm_to_vmem [thread:$0]  %s1813_s2, 6144, %s24_s25, [#allocation3], %s1582_s11, %s1582_s11, %s1583_s12  }
  0x11   :  { %1579 = dma.done.wait [#allocation3], 6144  }
  0x12   :  { %1580 = vsyncadd [#allocation3], 4294961152  ;;  %v48_v0 = vld [vmem:[%s1811_s0] sm:$0xff]  ;;  %v49_v1 = vld [vmem:[%s1811_s0 + $0x8] sm:$0xff]  ;;  %vm80_vm0 = vcmask 523264  }
  0x13   :  { %v50_v2 = vld [vmem:[%s1811_s0 + $0x10] sm:$0xff]  ;;  %v56_v3 = vpack.c.bf16 %v49_v1, %v48_v0  ;;  %v51_v4 = vld [vmem:[%s1811_s0 + $0x18] sm:$0xff]  ;;  %v52_v6 = vld [vmem:[%s1811_s0 + $0x20] sm:$0xff] }
  0x14   :  { %v1648_v5 = vpack.c.bf16 %v51_v4, %v50_v2  ;;  %v53_v7 = vld [vmem:[%s1811_s0 + $0x28] sm:$0xff]  ;;  %v1659_v8 = vld [vmem:[%s1812_s1] sm:$0xff]   ;;  %v54_v10 = vld [vmem:[%s1811_s0 + $0x30] sm:$0xff] }
  0x15   :  { %1418 = vmatprep.subr.bf16.mxu1 %v56_v3  ;;  %v1662_v9 = vpack.c.bf16 %v53_v7, %v52_v6  ;;  %1426 = vmatprep.mubr.msk.bf16.mxu1 %vm80_vm0, %v1659_v8  ;;  %v55_v11 = vld [vmem:[%s1811_s0 + $0x38] sm:$0xff]  ;;  %v1473_v13 = vld [vmem:[#allocation2 + $0x40] sm:$0xff]   ;;  %v1680_v14 = vld [vmem:[%s1812_s1 + $0x8] sm:$0xff]  }
  0x16   :  { %1419 = vmatpush3.bf16.msra.mxu1 %v56_v3  ;;  %1442 = vmatprep.mubr.msk.bf16.mxu0 %vm80_vm0, %v1659_v8  ;;  %v59_v12 = vpack.c.bf16 %v55_v11, %v54_v10  ;;  %v1685_v15 = vld [vmem:[%s1812_s1 + $0x10] sm:$0xff]   ;;  %v1474_v16 = vld [vmem:[#allocation2] sm:$0xff]   ;;  %v1475_v17 = vld [vmem:[#allocation2 + $0x48] sm:$0xff]  }
  0x17   :  { %1420 = vmatprep.subr.bf16.mxu1 %v1648_v5  ;;  %v1476_v18 = vld [vmem:[#allocation2 + $0x8] sm:$0xff]   ;;  %v1477_v19 = vld [vmem:[#allocation2 + $0x50] sm:$0xff]   ;;  %v1694_v20 = vld [vmem:[%s1812_s1 + $0x18] sm:$0xff]  }
  0x18   :  { %v1478_v21 = vld [vmem:[#allocation2 + $0x10] sm:$0xff]   ;;  %v1479_v22 = vld [vmem:[#allocation2 + $0x58] sm:$0xff]   ;;  %v1481_v24 = vld [vmem:[#allocation2 + $0x60] sm:$0xff]  }
  0x19   :  { %v1480_v23 = vld [vmem:[#allocation2 + $0x18] sm:$0xff]   ;;  %v1482_v25 = vld [vmem:[#allocation2 + $0x20] sm:$0xff]   ;;  %v1483_v26 = vld [vmem:[#allocation2 + $0x68] sm:$0xff]  }
  0x1a   :  { %1421 = vmatpush3.bf16.msra.mxu1 %v1648_v5  ;;  %v1484_v27 = vld [vmem:[#allocation2 + $0x28] sm:$0xff]   ;;  %v1485_v28 = vld [vmem:[#allocation2 + $0x70] sm:$0xff]   ;;  %v1487_v30 = vld [vmem:[#allocation2 + $0x78] sm:$0xff]  }
  0x1b   :  { %1422 = vmatprep.subr.bf16.mxu1 %v1662_v9  ;;  %v1486_v29 = vld [vmem:[#allocation2 + $0x30] sm:$0xff]   ;;  %v1488_v31 = vld [vmem:[#allocation2 + $0x38] sm:$0xff]   ;;  %v1207_v48 = vld [vmem:[%s1814_s3] ss:$0 sm:$0xff] }
  0x1e   :  { %1423 = vmatpush3.bf16.msra.mxu1 %v1662_v9 }
  0x1f   :  { %1424 = vmatprep.subr.bf16.mxu1 %v59_v12 }
  0x22   :  { %1425 = vmatpush3.bf16.msra.mxu1 %v59_v12 }
  0x23   :  { %1282 = vmatprep.subr.bf16.mxu1 %v1473_v13 }
  0x25   :  { %1427 = vmatmul.mubr.msk.bf16.vlgmr.msra.gmra.mrb[0].mxu1 %vm80_vm0, %v1680_v14 }
  0x26   :  { %1430 = vmatprep.mubr.msk.bf16.mxu1 %vm80_vm0, %v1685_v15  ;;  %1283 = vmatpush3.bf16.msra.mxu1 %v1474_v16 }
  0x27   :  { %1284 = vmatprep.subr.bf16.mxu1 %v1475_v17 }
  0x2a   :  { %1285 = vmatpush3.bf16.msra.mxu1 %v1476_v18 }
  0x2b   :  { %1286 = vmatprep.subr.bf16.mxu1 %v1477_v19 }
  0x2d   :  { %1431 = vmatmul.mubr.msk.bf16.gmra.mrb[4].mxu1 %vm80_vm0, %v1694_v20 }
  0x2e   :  { %1287 = vmatpush3.bf16.msra.mxu1 %v1478_v21  ;;  %329 = vmatprep.mubr.bf16.mxu1 %v56_v3 }
  0x2f   :  { %1288 = vmatprep.subr.bf16.mxu1 %v1479_v22 }
  0x32   :  { %1289 = vmatpush3.bf16.msra.mxu1 %v1480_v23 }
  0x33   :  { %1290 = vmatprep.subr.bf16.mxu1 %v1481_v24 }
  0x36   :  { %1291 = vmatpush3.bf16.msra.mxu1 %v1482_v25 }
  0x37   :  { %1292 = vmatprep.subr.bf16.mxu1 %v1483_v26 }
  0x3a   :  { %1293 = vmatpush3.bf16.msra.mxu1 %v1484_v27 }
  0x3b   :  { %1294 = vmatprep.subr.bf16.mxu1 %v1485_v28 }
  0x3e   :  { %1295 = vmatpush3.bf16.msra.mxu1 %v1486_v29 }
  0x3f   :  { %1296 = vmatprep.subr.bf16.mxu1 %v1487_v30 }
  0x42   :  { %1297 = vmatpush3.bf16.msra.mxu1 %v1488_v31 }
  0xf8   :  { %v1428_v32 = vpop.f32.mrb[0].mxu1 }
  0xf9   :  { %v127_v33 = vpop.f32.mrb[1].mxu1 }
  0xfa   :  { %v1429_v34 = vpop.f32.mrb[2].mxu1 }
  0xfb   :  { %v159_v35 = vpack.c.bf16 %v1429_v34, %v1428_v32  ;;  %v130_v36 = vpop.f32.mrb[3].mxu1 }
  0xfc   :  { %v158_v37 = vpack.c.bf16 %v130_v36, %v127_v33 }
  0xfe   :  { %330 = vmatmul.mubr.bf16.vlgmr.msra.gmra.mrb[8].mxu1 %v158_v37 }
  0xff   :  { %337 = vmatprep.mubr.bf16.mxu1 %v1648_v5 }
 0x100   :  { %v1432_v38 = vpop.f32.mrb[4].mxu1 }
 0x101   :  { %v143_v39 = vpop.f32.mrb[5].mxu1 }
 0x102   :  { %v1433_v40 = vpop.f32.mrb[6].mxu1 }
 0x103   :  { %v161_v41 = vpack.c.bf16 %v1433_v40, %v1432_v38  ;;  %v146_v42 = vpop.f32.mrb[7].mxu1 }
 0x104   :  { %v160_v43 = vpack.c.bf16 %v146_v42, %v143_v39 }
 0x106   :  { %338 = vmatmul.mubr.bf16.gmra.mrb[12].mxu1 %v159_v35 }
 0x107   :  { %345 = vmatprep.mubr.bf16.mxu1 %v1662_v9 }
 0x10e   :  { %346 = vmatmul.mubr.bf16.gmra.mrb[16].mxu1 %v160_v43 }
 0x10f   :  { %353 = vmatprep.mubr.bf16.mxu1 %v59_v12 }
 0x116   :  { %354 = vmatmul.mubr.bf16.gmra.mrb[20].mxu1 %v161_v41 }
 0x117   :  { %1458 = vmatprep.mubr.msk.bf16.mxu1 %vm80_vm0, %v1659_v8 }
 0x1d1   :  { %v1298_v44 = vpop.f32.mrb[8].mxu1 }
 0x1d2   :  { %v1299_v45 = vpop.f32.mrb[9].mxu1 }
 0x1d3   :  { %v1300_v46 = vadd.f32 %v1299_v45, %v1298_v44  ;;  %v1301_v47 = vpop.f32.mrb[10].mxu1 }
 0x1d4   :  { %v1302_v49 = vpop.f32.mrb[11].mxu1 }
 0x1d5   :  { %v1303_v50 = vadd.f32 %v1302_v49, %v1301_v47  ;;  %v332_v51 = vadd.f32 %v1300_v46, %v1207_v48 }
 0x1d7   :  { %v335_v52 = vadd.f32 %v1303_v50, %v1207_v48 }
 0x1d9   :  { %v362_v53 = vadd.f32 %v335_v52, %v332_v51  ;;  %v1304_v54 = vpop.f32.mrb[12].mxu1 }
 0x1da   :  { %v1305_v55 = vpop.f32.mrb[13].mxu1 }
 0x1db   :  { %v1306_v56 = vadd.f32 %v1305_v55, %v1304_v54  ;;  %v1307_v57 = vpop.f32.mrb[14].mxu1 }
 0x1dc   :  { %v1308_v58 = vpop.f32.mrb[15].mxu1 }
 0x1dd   :  { %v340_v59 = vadd.f32 %v1306_v56, %v1207_v48  ;;  %v1309_v60 = vadd.f32 %v1308_v58, %v1307_v57 }
 0x1df   :  { %v363_v61 = vadd.f32 %v362_v53, %v340_v59  ;;  %v343_v62 = vadd.f32 %v1309_v60, %v1207_v48 }
 0x1e1   :  { %v364_v63 = vadd.f32 %v363_v61, %v343_v62  ;;  %v1310_v0 = vpop.f32.mrb[16].mxu1 }
 0x1e2   :  { %v1311_v1 = vpop.f32.mrb[17].mxu1 }
 0x1e3   :  { %v1312_v2 = vadd.f32 %v1311_v1, %v1310_v0  ;;  %v1313_v3 = vpop.f32.mrb[18].mxu1 }
 0x1e4   :  { %v1314_v4 = vpop.f32.mrb[19].mxu1 }
 0x1e5   :  { %v348_v5 = vadd.f32 %v1312_v2, %v1207_v48  ;;  %v1315_v6 = vadd.f32 %v1314_v4, %v1313_v3  ;;  %v1225_v3 = vld [vmem:[%s1816_s5] ss:$0 sm:$0xff] }
 0x1e7   :  { %v365_v7 = vadd.f32 %v364_v63, %v348_v5  ;;  %v351_v8 = vadd.f32 %v1315_v6, %v1207_v48 }
 0x1e9   :  { %v366_v9 = vadd.f32 %v365_v7, %v351_v8  ;;  %v1316_v10 = vpop.f32.mrb[20].mxu1 }
 0x1ea   :  { %v1317_v11 = vpop.f32.mrb[21].mxu1 }
 0x1eb   :  { %v1318_v12 = vadd.f32 %v1317_v11, %v1316_v10  ;;  %v1319_v13 = vpop.f32.mrb[22].mxu1 }
 0x1ec   :  { %v1320_v16 = vpop.f32.mrb[23].mxu1 }
 0x1ed   :  { %v356_v17 = vadd.f32 %v1318_v12, %v1207_v48  ;;  %v1321_v18 = vadd.f32 %v1320_v16, %v1319_v13 }
 0x1ef   :  { %v367_v19 = vadd.f32 %v366_v9, %v356_v17  ;;  %v359_v21 = vadd.f32 %v1321_v18, %v1207_v48 }
 0x1f1   :  { %v368_v22 = vadd.f32 %v367_v19, %v359_v21 }
 0x1f3   :  { %v369_v23 = vrot.slane %v368_v22, 4 }
 0x1f5   :  { %v370_v24 = vadd.f32 %v369_v23, %v368_v22 }
 0x1f7   :  { %v371_v25 = vrot.slane %v370_v24, 2 }
 0x1f9   :  { %v372_v26 = vadd.f32 %v371_v25, %v370_v24 }
 0x1fb   :  { %v373_v27 = vrot.slane %v372_v26, 1 }
 0x1fd   :  { %v374_v28 = vadd.f32 %v373_v27, %v372_v26 }
 0x1ff   :  { %v376_v29 = vmul.f32 0.015625, %v374_v28 }
 0x201   :  { %v377_v30 = vsub.f32 %v332_v51, %v376_v29  ;;  %v378_v31 = vsub.f32 %v335_v52, %v376_v29  ;;  %v379_v32 = vsub.f32 %v340_v59, %v376_v29  ;;  %v380_v33 = vsub.f32 %v343_v62, %v376_v29  ;;  %v1224_v62 = vld [vmem:[%s1815_s4] ss:$0 sm:$0xff] }
 0x202   :  { %v381_v34 = vsub.f32 %v348_v5, %v376_v29  ;;  %v382_v35 = vsub.f32 %v351_v8, %v376_v29  ;;  %v383_v36 = vsub.f32 %v356_v17, %v376_v29  ;;  %v384_v37 = vsub.f32 %v359_v21, %v376_v29 }
 0x203   :  { %v385_v38 = vmul.f32 %v377_v30, %v377_v30  ;;  %v386_v39 = vmul.f32 %v378_v31, %v378_v31  ;;  %v387_v40 = vmul.f32 %v379_v32, %v379_v32  ;;  %v388_v42 = vmul.f32 %v380_v33, %v380_v33 }
 0x204   :  { %v389_v44 = vmul.f32 %v381_v34, %v381_v34  ;;  %v390_v46 = vmul.f32 %v382_v35, %v382_v35  ;;  %v391_v48 = vmul.f32 %v383_v36, %v383_v36  ;;  %v392_v50 = vmul.f32 %v384_v37, %v384_v37 }
 0x205   :  { %v393_v41 = vadd.f32 %v386_v39, %v385_v38  ;;  %v1496_v38 = vld [vmem:[#allocation2 + $0x98] sm:$0xff]   ;;  %v1497_v39 = vld [vmem:[#allocation2 + $0xe0] sm:$0xff]  }
 0x207   :  { %v394_v43 = vadd.f32 %v393_v41, %v387_v40  ;;  %v1498_v40 = vld [vmem:[#allocation2 + $0xa0] sm:$0xff]   ;;  %v1499_v41 = vld [vmem:[#allocation2 + $0xe8] sm:$0xff]  }
 0x209   :  { %v395_v45 = vadd.f32 %v394_v43, %v388_v42  ;;  %v1500_v42 = vld [vmem:[#allocation2 + $0xa8] sm:$0xff]   ;;  %v1501_v43 = vld [vmem:[#allocation2 + $0xf0] sm:$0xff]  }
 0x20b   :  { %v396_v47 = vadd.f32 %v395_v45, %v389_v44  ;;  %v1502_v44 = vld [vmem:[#allocation2 + $0xb0] sm:$0xff]   ;;  %v1503_v45 = vld [vmem:[#allocation2 + $0xf8] sm:$0xff]  }
 0x20d   :  { %v397_v49 = vadd.f32 %v396_v47, %v390_v46  ;;  %v1504_v46 = vld [vmem:[#allocation2 + $0xb8] sm:$0xff]  }
 0x20f   :  { %v398_v51 = vadd.f32 %v397_v49, %v391_v48 }
 0x211   :  { %v399_v52 = vadd.f32 %v398_v51, %v392_v50 }
 0x213   :  { %v400_v53 = vrot.slane %v399_v52, 4 }
 0x215   :  { %v401_v54 = vadd.f32 %v400_v53, %v399_v52 }
 0x217   :  { %v402_v55 = vrot.slane %v401_v54, 2 }
 0x219   :  { %v403_v56 = vadd.f32 %v402_v55, %v401_v54 }
 0x21b   :  { %v404_v57 = vrot.slane %v403_v56, 1 }
 0x21d   :  { %v405_v58 = vadd.f32 %v404_v57, %v403_v56 }
 0x21f   :  { %v406_v59 = vmul.f32 0.015625, %v405_v58 }
 0x221   :  { %v407_v60 = vadd.f32 1e-05, %v406_v59  ;;  %v1505_v59 = vld [vmem:[#allocation2 + $0x140] sm:$0xff]  }
 0x223   :  { %1521 = vrsqrt.f32 %v407_v60  ;;  %v1506_v60 = vld [vmem:[#allocation2 + $0x100] sm:$0xff]  }
 0x22d   :  { %v1522_v61 = vpop.eup %1521 }
 0x22e   :  { %v416_v63 = vmul.f32 %v1522_v61, %v384_v37  ;;  %v409_v0 = vmul.f32 %v1522_v61, %v377_v30  ;;  %v410_v1 = vmul.f32 %v1522_v61, %v378_v31  ;;  %v411_v2 = vmul.f32 %v1522_v61, %v379_v32  ;;  %v1489_v31 = vld [vmem:[#allocation2 + $0xc0] sm:$0xff]   ;;  %v1495_v37 = vld [vmem:[#allocation2 + $0xd8] sm:$0xff]  }
 0x22f   :  { %v412_v4 = vmul.f32 %v1522_v61, %v380_v33  ;;  %v413_v5 = vmul.f32 %v1522_v61, %v381_v34  ;;  %v414_v6 = vmul.f32 %v1522_v61, %v382_v35  ;;  %v415_v7 = vmul.f32 %v1522_v61, %v383_v36  ;;  %v1490_v32 = vld [vmem:[#allocation2 + $0x80] sm:$0xff]   ;;  %v1491_v33 = vld [vmem:[#allocation2 + $0xc8] sm:$0xff]   ;;  %v1493_v35 = vld [vmem:[#allocation2 + $0xd0] sm:$0xff]  }
 0x230   :  { %v424_v8 = vmul.f32 %v1224_v62, %v409_v0  ;;  %v425_v9 = vmul.f32 %v1224_v62, %v410_v1  ;;  %v426_v10 = vmul.f32 %v1224_v62, %v411_v2  ;;  %v431_v11 = vmul.f32 %v1224_v62, %v416_v63  ;;  %v1492_v34 = vld [vmem:[#allocation2 + $0x88] sm:$0xff]   ;;  %v1494_v36 = vld [vmem:[#allocation2 + $0x90] sm:$0xff]  }
 0x231   :  { %v427_v12 = vmul.f32 %v1224_v62, %v412_v4  ;;  %v428_v13 = vmul.f32 %v1224_v62, %v413_v5  ;;  %v429_v16 = vmul.f32 %v1224_v62, %v414_v6  ;;  %v430_v17 = vmul.f32 %v1224_v62, %v415_v7  ;;  %v1507_v61 = vld [vmem:[#allocation2 + $0x148] sm:$0xff]   ;;  %v1509_v1 = vld [vmem:[#allocation2 + $0x150] sm:$0xff]   ;;  %v1231_v4 = vld [vmem:[%s1814_s3 + $0x1] ss:$0 sm:$0xff] }
 0x232   :  { %v439_v18 = vadd.f32 %v1225_v3, %v424_v8  ;;  %v440_v19 = vadd.f32 %v1225_v3, %v425_v9  ;;  %v441_v21 = vadd.f32 %v1225_v3, %v426_v10  ;;  %v446_v22 = vadd.f32 %v1225_v3, %v431_v11  ;;  %v1508_v63 = vld [vmem:[#allocation2 + $0x108] sm:$0xff]   ;;  %v1510_v7 = vld [vmem:[#allocation2 + $0x110] sm:$0xff]   ;;  %v1511_v8 = vld [vmem:[#allocation2 + $0x158] sm:$0xff]  }
 0x233   :  { %v442_v23 = vadd.f32 %v1225_v3, %v427_v12  ;;  %v443_v24 = vadd.f32 %v1225_v3, %v428_v13  ;;  %v444_v25 = vadd.f32 %v1225_v3, %v429_v16  ;;  %v445_v26 = vadd.f32 %v1225_v3, %v430_v17  ;;  %v1512_v13 = vld [vmem:[#allocation2 + $0x118] sm:$0xff]   ;;  %v1513_v17 = vld [vmem:[#allocation2 + $0x160] sm:$0xff]  }
 0x234   :  { %v447_v27 = vpack.c.bf16 %v440_v19, %v439_v18 }
 0x235   :  { %v448_v28 = vpack.c.bf16 %v442_v23, %v441_v21  ;;  %v449_v29 = vpack.c.bf16 %v444_v25, %v443_v24  ;;  %v450_v30 = vpack.c.bf16 %v446_v22, %v445_v26  ;;  %v1514_v24 = vld [vmem:[#allocation2 + $0x120] sm:$0xff]   ;;  %v1515_v25 = vld [vmem:[#allocation2 + $0x168] sm:$0xff]  }
 0x236   :  { %1434 = vmatprep.subr.bf16.mxu0 %v447_v27 }
 0x237   :  { %1435 = vmatpush3.bf16.msra.mxu0 %v447_v27 }
 0x238   :  { %1436 = vmatprep.subr.bf16.mxu0 %v448_v28 }
 0x23b   :  { %1437 = vmatpush3.bf16.msra.mxu0 %v448_v28 }
 0x23c   :  { %1438 = vmatprep.subr.bf16.mxu0 %v449_v29 }
 0x23f   :  { %1439 = vmatpush3.bf16.msra.mxu0 %v449_v29 }
 0x240   :  { %1440 = vmatprep.subr.bf16.mxu0 %v450_v30 }
 0x243   :  { %1441 = vmatpush3.bf16.msra.mxu0 %v450_v30 }
 0x244   :  { %1330 = vmatprep.subr.bf16.mxu0 %v1489_v31 }
 0x246   :  { %1443 = vmatmul.mubr.msk.bf16.vlgmr.msra.gmra.mrb[0].mxu0 %vm80_vm0, %v1680_v14 }
 0x247   :  { %1446 = vmatprep.mubr.msk.bf16.mxu0 %vm80_vm0, %v1685_v15  ;;  %1331 = vmatpush3.bf16.msra.mxu0 %v1490_v32  ;;  %v1517_v32 = vld [vmem:[#allocation2 + $0x170] sm:$0xff]  }
 0x248   :  { %1332 = vmatprep.subr.bf16.mxu0 %v1491_v33 }
 0x24b   :  { %1333 = vmatpush3.bf16.msra.mxu0 %v1492_v34 }
 0x24c   :  { %1334 = vmatprep.subr.bf16.mxu0 %v1493_v35 }
 0x24e   :  { %1447 = vmatmul.mubr.msk.bf16.gmra.mrb[4].mxu0 %vm80_vm0, %v1694_v20 }
 0x24f   :  { %689 = vmatprep.mubr.bf16.mxu0 %v447_v27  ;;  %1335 = vmatpush3.bf16.msra.mxu0 %v1494_v36 }
 0x250   :  { %1336 = vmatprep.subr.bf16.mxu0 %v1495_v37 }
 0x253   :  { %1337 = vmatpush3.bf16.msra.mxu0 %v1496_v38  ;;  %v1518_v38 = vld [vmem:[#allocation2 + $0x130] sm:$0xff]  }
 0x254   :  { %1338 = vmatprep.subr.bf16.mxu0 %v1497_v39 }
 0x257   :  { %1339 = vmatpush3.bf16.msra.mxu0 %v1498_v40 }
 0x258   :  { %1340 = vmatprep.subr.bf16.mxu0 %v1499_v41 }
 0x25b   :  { %1341 = vmatpush3.bf16.msra.mxu0 %v1500_v42 }
 0x25c   :  { %1342 = vmatprep.subr.bf16.mxu0 %v1501_v43 }
 0x25f   :  { %1343 = vmatpush3.bf16.msra.mxu0 %v1502_v44 }
 0x260   :  { %1344 = vmatprep.subr.bf16.mxu0 %v1503_v45 }
 0x263   :  { %1345 = vmatpush3.bf16.msra.mxu0 %v1504_v46 }
 0x264   :  { %1378 = vmatprep.subr.bf16.mxu0 %v1505_v59 }
 0x319   :  { %v1444_v47 = vpop.f32.mrb[0].mxu0 }
 0x31a   :  { %v485_v48 = vpop.f32.mrb[1].mxu0 }
 0x31b   :  { %v1445_v49 = vpop.f32.mrb[2].mxu0 }
 0x31c   :  { %v517_v50 = vpack.c.bf16 %v1445_v49, %v1444_v47  ;;  %v488_v51 = vpop.f32.mrb[3].mxu0 }
 0x31d   :  { %v516_v52 = vpack.c.bf16 %v488_v51, %v485_v48 }
 0x31f   :  { %690 = vmatmul.mubr.bf16.vlgmr.msra.gmra.mrb[8].mxu0 %v516_v52 }
 0x320   :  { %697 = vmatprep.mubr.bf16.mxu0 %v448_v28  ;;  %1379 = vmatpush3.bf16.msra.mxu0 %v1506_v60 }
 0x321   :  { %v1448_v53 = vpop.f32.mrb[4].mxu0  ;;  %1380 = vmatprep.subr.bf16.mxu0 %v1507_v61 }
 0x322   :  { %v501_v54 = vpop.f32.mrb[5].mxu0 }
 0x323   :  { %v1449_v55 = vpop.f32.mrb[6].mxu0 }
 0x324   :  { %v519_v56 = vpack.c.bf16 %v1449_v55, %v1448_v53  ;;  %v504_v57 = vpop.f32.mrb[7].mxu0  ;;  %1381 = vmatpush3.bf16.msra.mxu0 %v1508_v63 }
 0x325   :  { %v518_v58 = vpack.c.bf16 %v504_v57, %v501_v54  ;;  %1382 = vmatprep.subr.bf16.mxu0 %v1509_v1 }
 0x327   :  { %698 = vmatmul.mubr.bf16.gmra.mrb[12].mxu0 %v517_v50 }
 0x328   :  { %705 = vmatprep.mubr.bf16.mxu0 %v449_v29  ;;  %1383 = vmatpush3.bf16.msra.mxu0 %v1510_v7 }
 0x329   :  { %1384 = vmatprep.subr.bf16.mxu0 %v1511_v8 }
 0x32c   :  { %1385 = vmatpush3.bf16.msra.mxu0 %v1512_v13 }
 0x32d   :  { %1386 = vmatprep.subr.bf16.mxu0 %v1513_v17 }
 0x32f   :  { %706 = vmatmul.mubr.bf16.gmra.mrb[16].mxu0 %v518_v58 }
 0x330   :  { %713 = vmatprep.mubr.bf16.mxu0 %v450_v30  ;;  %1387 = vmatpush3.bf16.msra.mxu0 %v1514_v24  ;;  %v1516_v30 = vld [vmem:[#allocation2 + $0x128] sm:$0xff]  }
 0x331   :  { %1388 = vmatprep.subr.bf16.mxu0 %v1515_v25 }
 0x334   :  { %1389 = vmatpush3.bf16.msra.mxu0 %v1516_v30  ;;  %v1249_v30 = vld [vmem:[%s1815_s4 + $0x1] ss:$0 sm:$0xff] }
 0x335   :  { %1390 = vmatprep.subr.bf16.mxu0 %v1517_v32 }
 0x337   :  { %714 = vmatmul.mubr.bf16.gmra.mrb[20].mxu0 %v519_v56 }
 0x338   :  { %1391 = vmatpush3.bf16.msra.mxu0 %v1518_v38 }
 0x3f2   :  { %v1346_v62 = vpop.f32.mrb[8].mxu0 }
 0x3f3   :  { %v1347_v0 = vpop.f32.mrb[9].mxu0 }
 0x3f4   :  { %v1348_v2 = vadd.f32 %v1347_v0, %v1346_v62  ;;  %v1349_v3 = vpop.f32.mrb[10].mxu0 }
 0x3f5   :  { %v1350_v5 = vpop.f32.mrb[11].mxu0 }
 0x3f6   :  { %v1351_v6 = vadd.f32 %v1350_v5, %v1349_v3  ;;  %v692_v9 = vadd.f32 %v1348_v2, %v1231_v4 }
 0x3f8   :  { %v695_v10 = vadd.f32 %v1351_v6, %v1231_v4 }
 0x3fa   :  { %v722_v11 = vadd.f32 %v695_v10, %v692_v9  ;;  %v1352_v12 = vpop.f32.mrb[12].mxu0 }
 0x3fb   :  { %v1353_v16 = vpop.f32.mrb[13].mxu0 }
 0x3fc   :  { %v1354_v18 = vadd.f32 %v1353_v16, %v1352_v12  ;;  %v1355_v19 = vpop.f32.mrb[14].mxu0 }
 0x3fd   :  { %v1356_v21 = vpop.f32.mrb[15].mxu0 }
 0x3fe   :  { %v700_v22 = vadd.f32 %v1354_v18, %v1231_v4  ;;  %v1357_v23 = vadd.f32 %v1356_v21, %v1355_v19 }
 0x400   :  { %v723_v26 = vadd.f32 %v722_v11, %v700_v22  ;;  %v703_v27 = vadd.f32 %v1357_v23, %v1231_v4 }
 0x402   :  { %v724_v28 = vadd.f32 %v723_v26, %v703_v27  ;;  %v1358_v29 = vpop.f32.mrb[16].mxu0 }
 0x403   :  { %v1359_v31 = vpop.f32.mrb[17].mxu0 }
 0x404   :  { %v1360_v33 = vadd.f32 %v1359_v31, %v1358_v29  ;;  %v1361_v34 = vpop.f32.mrb[18].mxu0 }
 0x405   :  { %v1362_v35 = vpop.f32.mrb[19].mxu0 }
 0x406   :  { %v708_v36 = vadd.f32 %v1360_v33, %v1231_v4  ;;  %v1363_v37 = vadd.f32 %v1362_v35, %v1361_v34  ;;  %v1251_v35 = vld [vmem:[%s1816_s5 + $0x1] ss:$0 sm:$0xff] }
 0x408   :  { %v725_v39 = vadd.f32 %v724_v28, %v708_v36  ;;  %v711_v40 = vadd.f32 %v1363_v37, %v1231_v4 }
 0x40a   :  { %v726_v41 = vadd.f32 %v725_v39, %v711_v40  ;;  %v1364_v42 = vpop.f32.mrb[20].mxu0 }
 0x40b   :  { %v1365_v43 = vpop.f32.mrb[21].mxu0 }
 0x40c   :  { %v1366_v44 = vadd.f32 %v1365_v43, %v1364_v42  ;;  %v1367_v45 = vpop.f32.mrb[22].mxu0 }
 0x40d   :  { %v1368_v46 = vpop.f32.mrb[23].mxu0 }
 0x40e   :  { %v716_v47 = vadd.f32 %v1366_v44, %v1231_v4  ;;  %v1369_v48 = vadd.f32 %v1368_v46, %v1367_v45 }
 0x410   :  { %v727_v49 = vadd.f32 %v726_v41, %v716_v47  ;;  %v719_v50 = vadd.f32 %v1369_v48, %v1231_v4 }
 0x412   :  { %v728_v51 = vadd.f32 %v727_v49, %v719_v50 }
 0x414   :  { %v729_v52 = vrot.slane %v728_v51, 4 }
 0x416   :  { %v730_v53 = vadd.f32 %v729_v52, %v728_v51 }
 0x418   :  { %v731_v54 = vrot.slane %v730_v53, 2 }
 0x41a   :  { %v732_v55 = vadd.f32 %v731_v54, %v730_v53 }
 0x41c   :  { %v733_v56 = vrot.slane %v732_v55, 1 }
 0x41e   :  { %v734_v57 = vadd.f32 %v733_v56, %v732_v55 }
 0x420   :  { %v735_v58 = vmul.f32 0.015625, %v734_v57 }
 0x422   :  { %v736_v59 = vsub.f32 %v692_v9, %v735_v58  ;;  %v737_v60 = vsub.f32 %v695_v10, %v735_v58  ;;  %v738_v61 = vsub.f32 %v700_v22, %v735_v58  ;;  %v739_v62 = vsub.f32 %v703_v27, %v735_v58 }
 0x423   :  { %v740_v63 = vsub.f32 %v708_v36, %v735_v58  ;;  %v741_v0 = vsub.f32 %v711_v40, %v735_v58  ;;  %v742_v1 = vsub.f32 %v716_v47, %v735_v58  ;;  %v743_v2 = vsub.f32 %v719_v50, %v735_v58 }
 0x424   :  { %v744_v3 = vmul.f32 %v736_v59, %v736_v59  ;;  %v745_v5 = vmul.f32 %v737_v60, %v737_v60  ;;  %v746_v6 = vmul.f32 %v738_v61, %v738_v61  ;;  %v747_v7 = vmul.f32 %v739_v62, %v739_v62 }
 0x425   :  { %v748_v11 = vmul.f32 %v740_v63, %v740_v63  ;;  %v749_v13 = vmul.f32 %v741_v0, %v741_v0  ;;  %v750_v17 = vmul.f32 %v742_v1, %v742_v1  ;;  %v751_v9 = vmul.f32 %v743_v2, %v743_v2 }
 0x426   :  { %v752_v4 = vadd.f32 %v745_v5, %v744_v3 }
 0x428   :  { %v753_v8 = vadd.f32 %v752_v4, %v746_v6 }
 0x42a   :  { %v754_v12 = vadd.f32 %v753_v8, %v747_v7 }
 0x42c   :  { %v755_v16 = vadd.f32 %v754_v12, %v748_v11 }
 0x42e   :  { %v756_v18 = vadd.f32 %v755_v16, %v749_v13  ;;  %v1257_v13 = vld [vmem:[%s1814_s3 + $0x2] ss:$0 sm:$0xff] }
 0x430   :  { %v757_v10 = vadd.f32 %v756_v18, %v750_v17 }
 0x432   :  { %v758_v19 = vadd.f32 %v757_v10, %v751_v9 }
 0x434   :  { %v759_v21 = vrot.slane %v758_v19, 4 }
 0x436   :  { %v760_v22 = vadd.f32 %v759_v21, %v758_v19 }
 0x438   :  { %v761_v23 = vrot.slane %v760_v22, 2 }
 0x43a   :  { %v762_v24 = vadd.f32 %v761_v23, %v760_v22 }
 0x43c   :  { %v763_v25 = vrot.slane %v762_v24, 1 }
 0x43e   :  { %v764_v26 = vadd.f32 %v763_v25, %v762_v24 }
 0x440   :  { %v765_v27 = vmul.f32 0.015625, %v764_v26 }
 0x442   :  { %v766_v28 = vadd.f32 1e-05, %v765_v27 }
 0x444   :  { %1523 = vrsqrt.f32 %v766_v28 }
 0x44e   :  { %v1524_v29 = vpop.eup %1523 }
 0x44f   :  { %v775_v31 = vmul.f32 %v1524_v29, %v743_v2  ;;  %v768_v32 = vmul.f32 %v1524_v29, %v736_v59  ;;  %v769_v33 = vmul.f32 %v1524_v29, %v737_v60  ;;  %v770_v34 = vmul.f32 %v1524_v29, %v738_v61  ;;  %v1519_v60 = vld [vmem:[#allocation2 + $0x178] sm:$0xff]  }
 0x450   :  { %v771_v36 = vmul.f32 %v1524_v29, %v739_v62  ;;  %v772_v37 = vmul.f32 %v1524_v29, %v740_v63  ;;  %v773_v38 = vmul.f32 %v1524_v29, %v741_v0  ;;  %v774_v39 = vmul.f32 %v1524_v29, %v742_v1  ;;  %v1520_v61 = vld [vmem:[#allocation2 + $0x138] sm:$0xff]   ;;  %1392 = vmatprep.subr.bf16.mxu0 %v1519_v60 }
 0x451   :  { %v784_v40 = vmul.f32 %v1249_v30, %v768_v32  ;;  %v785_v41 = vmul.f32 %v1249_v30, %v769_v33  ;;  %v786_v42 = vmul.f32 %v1249_v30, %v770_v34  ;;  %v791_v43 = vmul.f32 %v1249_v30, %v775_v31  ;;  %1393 = vmatpush3.bf16.msra.mxu0 %v1520_v61 }
 0x452   :  { %v787_v44 = vmul.f32 %v1249_v30, %v771_v36  ;;  %v788_v45 = vmul.f32 %v1249_v30, %v772_v37  ;;  %v789_v46 = vmul.f32 %v1249_v30, %v773_v38  ;;  %v790_v47 = vmul.f32 %v1249_v30, %v774_v39 }
 0x453   :  { %v800_v48 = vadd.f32 %v1251_v35, %v784_v40  ;;  %v801_v49 = vadd.f32 %v1251_v35, %v785_v41  ;;  %v802_v50 = vadd.f32 %v1251_v35, %v786_v42  ;;  %v807_v51 = vadd.f32 %v1251_v35, %v791_v43 }
 0x454   :  { %v803_v52 = vadd.f32 %v1251_v35, %v787_v44  ;;  %v804_v53 = vadd.f32 %v1251_v35, %v788_v45  ;;  %v805_v54 = vadd.f32 %v1251_v35, %v789_v46  ;;  %v806_v55 = vadd.f32 %v1251_v35, %v790_v47 }
 0x455   :  { %v808_v56 = vpack.c.bf16 %v801_v49, %v800_v48 }
 0x456   :  { %v809_v57 = vpack.c.bf16 %v803_v52, %v802_v50  ;;  %v810_v58 = vpack.c.bf16 %v805_v54, %v804_v53  ;;  %v811_v59 = vpack.c.bf16 %v807_v51, %v806_v55 }
 0x457   :  { %1450 = vmatprep.subr.bf16.mxu1 %v808_v56  ;;  %1050 = vmatprep.mubr.bf16.mxu0 %v808_v56 }
 0x458   :  { %1451 = vmatpush3.bf16.msra.mxu1 %v808_v56 }
 0x459   :  { %1452 = vmatprep.subr.bf16.mxu1 %v809_v57 }
 0x45c   :  { %1453 = vmatpush3.bf16.msra.mxu1 %v809_v57 }
 0x45d   :  { %1454 = vmatprep.subr.bf16.mxu1 %v810_v58 }
 0x460   :  { %1455 = vmatpush3.bf16.msra.mxu1 %v810_v58 }
 0x461   :  { %1456 = vmatprep.subr.bf16.mxu1 %v811_v59 }
 0x464   :  { %1457 = vmatpush3.bf16.msra.mxu1 %v811_v59 }
 0x467   :  { %1459 = vmatmul.mubr.msk.bf16.vlgmr.msra.gmra.mrb[24].mxu1 %vm80_vm0, %v1680_v14 }
 0x468   :  { %1462 = vmatprep.mubr.msk.bf16.mxu1 %vm80_vm0, %v1685_v15 }
 0x46f   :  { %1463 = vmatmul.mubr.msk.bf16.gmra.mrb[28].mxu1 %vm80_vm0, %v1694_v20  ;;  %v1091_v20 = vlaneseq }
 0x471   :  { %v1092_v8 = vand.u32 127, %v1091_v20 }
 0x473   :  { %vm1093_vm1 = vcmp.lt.s32.totalorder %v1092_v8, 8 }
 0x53a   :  { %v1460_v62 = vpop.f32.mrb[24].mxu1 }
 0x53b   :  { %v846_v63 = vpop.f32.mrb[25].mxu1 }
 0x53c   :  { %v1461_v0 = vpop.f32.mrb[26].mxu1 }
 0x53d   :  { %v878_v1 = vpack.c.bf16 %v1461_v0, %v1460_v62  ;;  %v849_v2 = vpop.f32.mrb[27].mxu1 }
 0x53e   :  { %v877_v3 = vpack.c.bf16 %v849_v2, %v846_v63 }
 0x540   :  { %1051 = vmatmul.mubr.bf16.vlgmr.msra.gmra.mrb[24].mxu0 %v877_v3 }
 0x541   :  { %1058 = vmatprep.mubr.bf16.mxu0 %v809_v57 }
 0x542   :  { %v1464_v5 = vpop.f32.mrb[28].mxu1 }
 0x543   :  { %v862_v14 = vpop.f32.mrb[29].mxu1 }
 0x544   :  { %v1465_v6 = vpop.f32.mrb[30].mxu1 }
 0x545   :  { %v880_v4 = vpack.c.bf16 %v1465_v6, %v1464_v5  ;;  %v865_v15 = vpop.f32.mrb[31].mxu1 }
 0x546   :  { %v879_v7 = vpack.c.bf16 %v865_v15, %v862_v14 }
 0x548   :  { %1059 = vmatmul.mubr.bf16.gmra.mrb[28].mxu0 %v878_v1 }
 0x549   :  { %1066 = vmatprep.mubr.bf16.mxu0 %v810_v58 }
 0x550   :  { %1067 = vmatmul.mubr.bf16.gmra.mrb[32].mxu0 %v879_v7 }
 0x551   :  { %1074 = vmatprep.mubr.bf16.mxu0 %v811_v59 }
 0x558   :  { %1075 = vmatmul.mubr.bf16.gmra.mrb[36].mxu0 %v880_v4 }
 0x613   :  { %v1394_v11 = vpop.f32.mrb[24].mxu0 }
 0x614   :  { %v1395_v12 = vpop.f32.mrb[25].mxu0 }
 0x615   :  { %v1396_v16 = vadd.f32 %v1395_v12, %v1394_v11  ;;  %v1397_v17 = vpop.f32.mrb[26].mxu0 }
 0x616   :  { %v1398_v18 = vpop.f32.mrb[27].mxu0 }
 0x617   :  { %v1399_v9 = vadd.f32 %v1398_v18, %v1397_v17  ;;  %v1053_v10 = vadd.f32 %v1396_v16, %v1257_v13 }
 0x619   :  { %v1094_v19 = vsel %vm1093_vm1, %v1053_v10, -1e+30  ;;  %1083 = vst [vmem:[%s1817_s6] sm:$0xff] %v1053_v10  ;;  %v1056_v21 = vadd.f32 %v1399_v9, %v1257_v13 }
 0x61a   :  { %1102 = vmax.xlane.f32.xlu0 %v1094_v19 }
 0x61b   :  { %v1400_v22 = vpop.f32.mrb[28].mxu0  ;;  %1084 = vst [vmem:[%s1817_s6 + $0x8] sm:$0xff] %v1056_v21  ;;  %v1095_v25 = vsel %vm1093_vm1, %v1056_v21, -1e+30 }
 0x61c   :  { %v1401_v23 = vpop.f32.mrb[29].mxu0 }
 0x61d   :  { %v1402_v24 = vadd.f32 %v1401_v23, %v1400_v22  ;;  %v1403_v26 = vpop.f32.mrb[30].mxu0 }
 0x61e   :  { %1104 = vmax.xlane.f32.xlu0 %v1095_v25  ;;  %v1404_v27 = vpop.f32.mrb[31].mxu0 }
 0x61f   :  { %v1405_v28 = vadd.f32 %v1404_v27, %v1403_v26  ;;  %v1061_v29 = vadd.f32 %v1402_v24, %v1257_v13 }
 0x621   :  { %v1096_v30 = vsel %vm1093_vm1, %v1061_v29, -1e+30  ;;  %1085 = vst [vmem:[%s1817_s6 + $0x10] sm:$0xff] %v1061_v29  ;;  %v1064_v31 = vadd.f32 %v1405_v28, %v1257_v13 }
 0x622   :  { %1106 = vmax.xlane.f32.xlu1 %v1096_v30 }
 0x623   :  { %v1406_v32 = vpop.f32.mrb[32].mxu0  ;;  %1086 = vst [vmem:[%s1817_s6 + $0x18] sm:$0xff] %v1064_v31  ;;  %v1097_v36 = vsel %vm1093_vm1, %v1064_v31, -1e+30 }
 0x624   :  { %v1407_v33 = vpop.f32.mrb[33].mxu0 }
 0x625   :  { %v1408_v34 = vadd.f32 %v1407_v33, %v1406_v32  ;;  %v1409_v35 = vpop.f32.mrb[34].mxu0 }
 0x626   :  { %1108 = vmax.xlane.f32.xlu1 %v1097_v36  ;;  %v1410_v37 = vpop.f32.mrb[35].mxu0 }
 0x627   :  { %v1411_v38 = vadd.f32 %v1410_v37, %v1409_v35  ;;  %v1069_v39 = vadd.f32 %v1408_v34, %v1257_v13 }
 0x629   :  { %v1098_v40 = vsel %vm1093_vm1, %v1069_v39, -1e+30  ;;  %1087 = vst [vmem:[%s1817_s6 + $0x20] sm:$0xff] %v1069_v39  ;;  %v1072_v41 = vadd.f32 %v1411_v38, %v1257_v13 }
 0x62a   :  { %1110 = vmax.xlane.f32.xlu0 %v1098_v40 }
 0x62b   :  { %v1412_v42 = vpop.f32.mrb[36].mxu0  ;;  %v1099_v43 = vsel %vm1093_vm1, %v1072_v41, -1e+30  ;;  %1088 = vst [vmem:[%s1817_s6 + $0x28] sm:$0xff] %v1072_v41 }
 0x62c   :  { %v1413_v44 = vpop.f32.mrb[37].mxu0  ;;  %1112 = vmax.xlane.f32.xlu1 %v1099_v43 }
 0x62d   :  { %v1414_v45 = vadd.f32 %v1413_v44, %v1412_v42  ;;  %v1415_v46 = vpop.f32.mrb[38].mxu0 }
 0x62e   :  { %v1416_v47 = vpop.f32.mrb[39].mxu0 }
 0x62f   :  { %v1417_v48 = vadd.f32 %v1416_v47, %v1415_v46  ;;  %v1077_v49 = vadd.f32 %v1414_v45, %v1257_v13 }
 0x631   :  { %1089 = vst [vmem:[%s1817_s6 + $0x30] sm:$0xff] %v1077_v49  ;;  %v1100_v50 = vsel %vm1093_vm1, %v1077_v49, -1e+30  ;;  %v1080_v51 = vadd.f32 %v1417_v48, %v1257_v13 }
 0x632   :  { %1114 = vmax.xlane.f32.xlu0 %v1100_v50 }
 0x633   :  { %1090 = vst [vmem:[%s1817_s6 + $0x38] sm:$0xff] %v1080_v51  ;;  %v1101_v52 = vsel %vm1093_vm1, %v1080_v51, -1e+30 }
 0x634   :  { %1116 = vmax.xlane.f32.xlu1 %v1101_v52 }
 0x6a7   :  { %v1103_v53 = vpop.xlane.xlu0 %1102 }
 0x6a8   :  { %v1118_v54 = vsub.f32 %v1094_v19, %v1103_v53 }
 0x6aa   :  { %v1126_v55 = vmul.f32 1.442695, %v1118_v54 }
 0x6ab   :  { %v1105_v56 = vpop.xlane.xlu0 %1104 }
 0x6ac   :  { %1525 = vpow2.f32 %v1126_v55  ;;  %v1767_v57 = vsub.f32 %v1095_v25, %v1105_v56 }
 0x6ae   :  { %v1128_v58 = vmul.f32 1.442695, %v1767_v57 }
 0x6af   :  { %v1107_v59 = vpop.xlane.xlu1 %1106 }
 0x6b0   :  { %1527 = vpow2.f32 %v1128_v58  ;;  %v1770_v60 = vsub.f32 %v1096_v30, %v1107_v59 }
 0x6b2   :  { %v1130_v61 = vmul.f32 1.442695, %v1770_v60 }
 0x6b3   :  { %v1109_v62 = vpop.xlane.xlu1 %1108 }
 0x6b4   :  { %1529 = vpow2.f32 %v1130_v61  ;;  %v1773_v63 = vsub.f32 %v1097_v36, %v1109_v62 }
 0x6b6   :  { %v1526_v0 = vpop.eup %1525  ;;  %v1132_v1 = vmul.f32 1.442695, %v1773_v63 }
 0x6b7   :  { %1142 = vadd.xlane.f32.xlu0 %v1526_v0  ;;  %v1111_v2 = vpop.xlane.xlu0 %1110 }
 0x6b8   :  { %1531 = vpow2.f32 %v1132_v1  ;;  %v1776_v3 = vsub.f32 %v1098_v40, %v1111_v2 }
 0x6b9   :  { %v1113_v5 = vpop.xlane.xlu1 %1112 }
 0x6ba   :  { %v1528_v14 = vpop.eup %1527  ;;  %v1134_v6 = vmul.f32 1.442695, %v1776_v3  ;;  %v1779_v4 = vsub.f32 %v1099_v43, %v1113_v5 }
 0x6bb   :  { %1144 = vadd.xlane.f32.xlu1 %v1528_v14 }
 0x6bc   :  { %1533 = vpow2.f32 %v1134_v6  ;;  %v1136_v15 = vmul.f32 1.442695, %v1779_v4 }
 0x6be   :  { %v1530_v7 = vpop.eup %1529  ;;  %1535 = vpow2.f32 %v1136_v15 }
 0x6bf   :  { %1146 = vadd.xlane.f32.xlu0 %v1530_v7  ;;  %v1115_v20 = vpop.xlane.xlu0 %1114 }
 0x6c0   :  { %v1124_v8 = vsub.f32 %v1100_v50, %v1115_v20 }
 0x6c1   :  { %v1117_v11 = vpop.xlane.xlu1 %1116 }
 0x6c2   :  { %v1532_v12 = vpop.eup %1531  ;;  %v1138_v13 = vmul.f32 1.442695, %v1124_v8  ;;  %v1125_v16 = vsub.f32 %v1101_v52, %v1117_v11 }
 0x6c3   :  { %1148 = vadd.xlane.f32.xlu1 %v1532_v12 }
 0x6c4   :  { %1537 = vpow2.f32 %v1138_v13  ;;  %v1140_v17 = vmul.f32 1.442695, %v1125_v16 }
 0x6c6   :  { %v1534_v18 = vpop.eup %1533  ;;  %1539 = vpow2.f32 %v1140_v17 }
 0x6c7   :  { %1150 = vadd.xlane.f32.xlu0 %v1534_v18 }
 0x6c8   :  { %v1536_v9 = vpop.eup %1535 }
 0x6c9   :  { %1152 = vadd.xlane.f32.xlu1 %v1536_v9 }
 0x6ce   :  { %v1538_v10 = vpop.eup %1537 }
 0x6cf   :  { %1154 = vadd.xlane.f32.xlu0 %v1538_v10 }
 0x6d0   :  { %v1540_v19 = vpop.eup %1539 }
 0x6d1   :  { %1156 = vadd.xlane.f32.xlu1 %v1540_v19 }
 0x744   :  { %v1143_v21 = vpop.xlane.xlu0 %1142 }
 0x745   :  { %1541 = vlog2.f32 %v1143_v21 }
 0x748   :  { %v1145_v22 = vpop.xlane.xlu1 %1144 }
 0x749   :  { %1543 = vlog2.f32 %v1145_v22 }
 0x74c   :  { %v1147_v23 = vpop.xlane.xlu0 %1146 }
 0x74d   :  { %1545 = vlog2.f32 %v1147_v23 }
 0x74f   :  { %v1542_v24 = vpop.eup %1541 }
 0x750   :  { %v1159_v25 = vmul.f32 0.6931472, %v1542_v24  ;;  %v1149_v26 = vpop.xlane.xlu1 %1148 }
 0x751   :  { %1547 = vlog2.f32 %v1149_v26 }
 0x752   :  { %v1174_v27 = vsub.f32 %v1118_v54, %v1159_v25 }
 0x753   :  { %v1544_v28 = vpop.eup %1543 }
 0x754   :  { %1182 = vst [vmem:[%s1818_s7] sm:$0xff] %v1174_v27  ;;  %v1161_v29 = vmul.f32 0.6931472, %v1544_v28  ;;  %v1151_v30 = vpop.xlane.xlu0 %1150 }
 0x755   :  { %1549 = vlog2.f32 %v1151_v30 }
 0x756   :  { %v1175_v31 = vsub.f32 %v1767_v57, %v1161_v29  ;;  %v1153_v32 = vpop.xlane.xlu1 %1152 }
 0x757   :  { %v1546_v33 = vpop.eup %1545  ;;  %1551 = vlog2.f32 %v1153_v32 }
 0x758   :  { %1183 = vst [vmem:[%s1818_s7 + $0x8] sm:$0xff] %v1175_v31  ;;  %v1163_v34 = vmul.f32 0.6931472, %v1546_v33 }
 0x75a   :  { %v1176_v35 = vsub.f32 %v1770_v60, %v1163_v34 }
 0x75b   :  { %v1548_v36 = vpop.eup %1547 }
 0x75c   :  { %1184 = vst [vmem:[%s1818_s7 + $0x10] sm:$0xff] %v1176_v35  ;;  %v1165_v37 = vmul.f32 0.6931472, %v1548_v36  ;;  %v1155_v38 = vpop.xlane.xlu0 %1154 }
 0x75d   :  { %1553 = vlog2.f32 %v1155_v38 }
 0x75e   :  { %v1177_v39 = vsub.f32 %v1773_v63, %v1165_v37  ;;  %v1157_v40 = vpop.xlane.xlu1 %1156 }
 0x75f   :  { %v1550_v41 = vpop.eup %1549  ;;  %1555 = vlog2.f32 %v1157_v40 }
 0x760   :  { %1185 = vst [vmem:[%s1818_s7 + $0x18] sm:$0xff] %v1177_v39  ;;  %v1167_v42 = vmul.f32 0.6931472, %v1550_v41 }
 0x761   :  { %v1552_v43 = vpop.eup %1551 }
 0x762   :  { %v1178_v44 = vsub.f32 %v1776_v3, %v1167_v42  ;;  %v1169_v45 = vmul.f32 0.6931472, %v1552_v43 }
 0x764   :  { %1186 = vst [vmem:[%s1818_s7 + $0x20] sm:$0xff] %v1178_v44  ;;  %v1179_v46 = vsub.f32 %v1779_v4, %v1169_v45 }
 0x766   :  { %1187 = vst [vmem:[%s1818_s7 + $0x28] sm:$0xff] %v1179_v46 }
 0x767   :  { %v1554_v47 = vpop.eup %1553 }
 0x768   :  { %v1171_v48 = vmul.f32 0.6931472, %v1554_v47 }
 0x769   :  { %v1556_v49 = vpop.eup %1555 }
 0x76a   :  { %v1180_v50 = vsub.f32 %v1124_v8, %v1171_v48  ;;  %v1173_v51 = vmul.f32 0.6931472, %v1556_v49 }
 0x76c   :  { %1188 = vst [vmem:[%s1818_s7 + $0x30] sm:$0xff] %v1180_v50  ;;  %v1181_v52 = vsub.f32 %v1125_v16, %v1173_v51 }
 0x76e   :  { %1189 = vst [vmem:[%s1818_s7 + $0x38] sm:$0xff] %v1181_v52 }
 0x76f   :  { %1198 = vsyncpa [#allocation3], 1 }

</bundles_post_ra>
